<compile_context>
chip_gen: v7x
topology: tpu7x:2x2x1
jax: 0.10.0
libtpu: 0.0.40
codegen_flags: <defaults>
</compile_context>

<pallas_src>
import math
import numpy as np
import jax
import jax.numpy as jnp
from jax.experimental import pallas as pl
from jax.experimental.pallas import tpu as pltpu


# ---------------------------------------------------------------------------
# Frequency-index / DCT-filter construction (parameter setup, plain numpy)
# ---------------------------------------------------------------------------
def get_freq_indices(method):
    assert method in ['top1', 'top2', 'top4', 'top8', 'top16', 'top32',
                      'bot1', 'bot2', 'bot4', 'bot8', 'bot16', 'bot32',
                      'low1', 'low2', 'low4', 'low8', 'low16', 'low32']
    num_freq = int(method[3:])
    if 'top' in method:
        all_x = [0, 0, 6, 0, 0, 1, 1, 4, 5, 1, 3, 0, 0, 0, 3, 2,
                 4, 6, 3, 5, 5, 2, 6, 5, 5, 3, 3, 4, 2, 2, 6, 1]
        all_y = [0, 1, 0, 5, 2, 0, 2, 0, 0, 6, 0, 4, 6, 3, 5, 2,
                 6, 3, 3, 3, 5, 1, 1, 2, 4, 2, 1, 1, 3, 0, 5, 3]
    elif 'low' in method:
        all_x = [0, 0, 1, 1, 0, 2, 2, 1, 2, 0, 3, 4, 0, 1, 3, 0,
                 1, 2, 3, 4, 5, 0, 1, 2, 3, 4, 5, 6, 1, 2, 3, 4]
        all_y = [0, 1, 0, 1, 2, 0, 1, 2, 2, 3, 0, 0, 4, 3, 1, 5,
                 4, 3, 2, 1, 0, 6, 5, 4, 3, 2, 1, 0, 6, 5, 4, 3]
    else:  # bot
        all_x = [6, 1, 3, 3, 2, 4, 1, 2, 4, 4, 5, 1, 4, 6, 2, 5,
                 6, 1, 6, 2, 2, 4, 3, 3, 5, 5, 6, 2, 5, 5, 3, 6]
        all_y = [6, 4, 4, 6, 6, 3, 1, 4, 4, 5, 6, 5, 2, 2, 5, 1,
                 4, 3, 5, 0, 3, 1, 1, 2, 4, 2, 1, 1, 5, 3, 3, 3]
    return all_x[:num_freq], all_y[:num_freq]


def _build_filter(pos, freq, POS):
    result = math.cos(math.pi * freq * (pos + 0.5) / POS) / math.sqrt(POS)
    return result if freq == 0 else result * math.sqrt(2)


def get_dct_filter(tile_x, tile_y, mapper_x, mapper_y, channel):
    dct_filter = np.zeros((channel, tile_x, tile_y), dtype=np.float32)
    c_part = channel // len(mapper_x)
    for i, (u_x, v_y) in enumerate(zip(mapper_x, mapper_y)):
        for t_x in range(tile_x):
            for t_y in range(tile_y):
                dct_filter[i * c_part:(i + 1) * c_part, t_x, t_y] = (
                    _build_filter(t_x, u_x, tile_x) * _build_filter(t_y, v_y, tile_y))
    return dct_filter


# ---------------------------------------------------------------------------
# Pallas kernel: fused (pool + DCT reduce) + squeeze-excite MLP + channel rescale
#   x_ref    : (tile_n, C, HW)   native NCHW (spatial flattened -> lanes)
#   wexp_ref : (C, HW)           pool-expanded DCT filter
#   w1_ref   : (C, C//r)         fc1 weight (transposed vs. torch)
#   w2_ref   : (C//r, C)         fc2 weight (transposed vs. torch)
#   out_ref  : (tile_n, C, HW)
# ---------------------------------------------------------------------------
def msa_kernel(x_ref, wexp_ref, w1_ref, w2_ref, out_ref):
    x = x_ref[...]
    xf = x.astype(jnp.float32)

    # fused adaptive-avg-pool + DCT weighted sum:  y[n, c] = sum_hw x[n, c, hw] * Wexp[c, hw]
    y = jnp.sum(xf * wexp_ref[...][None, :, :], axis=-1)               # (tile_n, C)

    # fc: Linear -> ReLU -> Linear -> Sigmoid  (tiny; keep in f32, off critical path)
    z1 = jnp.dot(y, w1_ref[...], preferred_element_type=jnp.float32)   # (tile_n, C//r)
    z1 = jnp.maximum(z1, 0.0)
    z2 = jnp.dot(z1, w2_ref[...], preferred_element_type=jnp.float32)  # (tile_n, C)
    z2 = jax.nn.sigmoid(z2)

    # channel-wise rescale: broadcast the gate along the lane (HW) axis
    out_ref[...] = x * z2.astype(x.dtype)[:, :, None]


def multi_spectral_attention(x_nchw, dct_filter_chw, w1_t, w2_t, dct_h, dct_w,
                             *, target_block_bytes=1 << 20):
    """x_nchw: (N, C, H, W).  dct_filter_chw: (C, dct_h, dct_w).  Returns (N, C, H, W)."""
    n, c, h, w = x_nchw.shape

    # Fold the (evenly-dividing) adaptive average pool into the DCT filter:
    #   Wexp[c, p, q] = W[c, p // kh, q // kw] / (kh * kw)
    if (h, w) != (dct_h, dct_w):
        assert h % dct_h == 0 and w % dct_w == 0, "adaptive pool must divide evenly"
        kh, kw = h // dct_h, w // dct_w
        wexp = jnp.repeat(jnp.repeat(dct_filter_chw, kh, axis=1), kw, axis=2) / float(kh * kw)
    else:
        wexp = dct_filter_chw
    wexp = wexp.reshape(c, h * w).astype(jnp.float32)

    hw = h * w
    x_flat = x_nchw.reshape(n, c, hw)          # free reshape, no transpose / HBM copy
    c_red = w1_t.shape[1]

    # Batch tiling: target ~1 MB x-blocks, but keep >= 2 grid steps so the DMA pipeline
    # and (on v7x) megacore sharding have work to overlap.
    per_sample_bytes = c * hw * x_flat.dtype.itemsize
    tile_n = max(1, min(n, target_block_bytes // per_sample_bytes))
    if n > 1:
        tile_n = min(tile_n, pl.cdiv(n, 2))
    grid = (pl.cdiv(n, tile_n),)

    out_flat = pl.pallas_call(
        msa_kernel,
        out_shape=jax.ShapeDtypeStruct((n, c, hw), x_flat.dtype),
        grid_spec=pltpu.PrefetchScalarGridSpec(
            num_scalar_prefetch=0,
            grid=grid,
            in_specs=[
                pl.BlockSpec((tile_n, c, hw), lambda i: (i, 0, 0)),   # streamed x
                pl.BlockSpec((c, hw), lambda i: (0, 0)),              # fetched once
                pl.BlockSpec((c, c_red), lambda i: (0, 0)),           # fetched once
                pl.BlockSpec((c_red, c), lambda i: (0, 0)),           # fetched once
            ],
            out_specs=pl.BlockSpec((tile_n, c, hw), lambda i: (i, 0, 0)),
        ),
        compiler_params=pltpu.CompilerParams(
            dimension_semantics=("parallel",),
        ),
    )(x_flat, wexp, w1_t, w2_t)

    return out_flat.reshape(n, c, h, w)


# ---------------------------------------------------------------------------
# Pure-JAX reference implementing the exact torch semantics (for correctness check)
# ---------------------------------------------------------------------------
def reference(x_nchw, dct_filter_chw, w1_pt, w2_pt, dct_h, dct_w):
    n, c, h, w = x_nchw.shape
    if (h, w) != (dct_h, dct_w):
        xp = x_nchw.reshape(n, c, dct_h, h // dct_h, dct_w, w // dct_w).mean(axis=(3, 5))
    else:
        xp = x_nchw
    y = jnp.sum(xp * dct_filter_chw[None], axis=(2, 3))           # (N, C)
    z1 = jnp.maximum(y @ w1_pt.T, 0.0)
    z2 = jax.nn.sigmoid(z1 @ w2_pt.T)
    return x_nchw * z2[:, :, None, None]


if __name__ == "__main__":
    # Small shapes consistent with the module: C divisible by 16 (top16 frequencies and
    # reduction=16), dct_h = dct_w = 7 (FcaNet convention), H = W = 14 so the adaptive
    # pool path is exercised.
    N, C, H, W = 2, 64, 14, 14
    DCT_H, DCT_W = 7, 7
    REDUCTION = 16
    C_RED = C // REDUCTION

    # DCT filter (buffer of MultiSpectralDCTLayer)
    mapper_x, mapper_y = get_freq_indices('top16')
    mapper_x = [mx * (DCT_H // 7) for mx in mapper_x]
    mapper_y = [my * (DCT_W // 7) for my in mapper_y]
    dct_filter_chw = jnp.asarray(get_dct_filter(DCT_H, DCT_W, mapper_x, mapper_y, C))

    # Deterministic parameter init (kaiming_normal_, mode='fan_out', relu)
    key = jax.random.PRNGKey(0)
    k_x, k_w1, k_w2 = jax.random.split(key, 3)
    w1_pt = jax.random.normal(k_w1, (C_RED, C), jnp.float32) * math.sqrt(2.0 / C_RED)
    w2_pt = jax.random.normal(k_w2, (C, C_RED), jnp.float32) * math.sqrt(2.0 / C)
    w1 = jnp.transpose(w1_pt)   # (C, C_RED)
    w2 = jnp.transpose(w2_pt)   # (C_RED, C)

    x = jax.random.normal(k_x, (N, C, H, W), jnp.float32)

    out = multi_spectral_attention(x, dct_filter_chw, w1, w2, DCT_H, DCT_W)
    out = jax.block_until_ready(out)

    ref = jax.block_until_ready(reference(x, dct_filter_chw, w1_pt, w2_pt, DCT_H, DCT_W))
    assert out.shape == (N, C, H, W)
    assert jnp.allclose(out, ref, rtol=1e-4, atol=1e-4), "mismatch vs. reference"

    print("KERNEL_OK")
</pallas_src>

<mosaic_0001>
module attributes {stable_mosaic.version = 11 : i64} {
  func.func @msa_kernel(%arg0: i32, %arg1: memref<1x64x196xf32, #tpu.memory_space<vmem>>, %arg2: memref<64x196xf32, #tpu.memory_space<vmem>>, %arg3: memref<64x4xf32, #tpu.memory_space<vmem>>, %arg4: memref<4x64xf32, #tpu.memory_space<vmem>>, %arg5: memref<1x64x196xf32, #tpu.memory_space<vmem>>) attributes {dimension_semantics = [#tpu.dimension_semantics<parallel>], iteration_bounds = array<i64: 2>, scalar_prefetch = 0 : i64, scratch_operands = 0 : i64, tpu.core_type = #tpu.core_type<tc>, window_params = [{transform_indices = @transform_0, window_bounds = array<i64: 1, 64, 196>}, {pipeline_mode = #tpu.pipeline_mode<synchronous>, transform_indices = @transform_1, window_bounds = array<i64: 64, 196>}, {pipeline_mode = #tpu.pipeline_mode<synchronous>, transform_indices = @transform_2, window_bounds = array<i64: 64, 4>}, {pipeline_mode = #tpu.pipeline_mode<synchronous>, transform_indices = @transform_3, window_bounds = array<i64: 4, 64>}, {transform_indices = @transform_4, window_bounds = array<i64: 1, 64, 196>}]} {
    %c0 = arith.constant 0 : index
    %c0_0 = arith.constant 0 : index
    %c0_1 = arith.constant 0 : index
    %0 = vector.load %arg1[%c0, %c0_0, %c0_1] : memref<1x64x196xf32, #tpu.memory_space<vmem>>, vector<1x64x196xf32>
    %c0_2 = arith.constant 0 : index
    %c0_3 = arith.constant 0 : index
    %1 = vector.load %arg2[%c0_2, %c0_3] : memref<64x196xf32, #tpu.memory_space<vmem>>, vector<64x196xf32>
    %2 = vector.shape_cast %1 : vector<64x196xf32> to vector<1x64x196xf32>
    %3 = arith.mulf %0, %2 : vector<1x64x196xf32>
    %cst = arith.constant dense<0.000000e+00> : vector<1x64xf32>
    %4 = vector.multi_reduction <add>, %3, %cst [2] : vector<1x64x196xf32> to vector<1x64xf32>
    %c0_4 = arith.constant 0 : index
    %c0_5 = arith.constant 0 : index
    %5 = vector.load %arg3[%c0_4, %c0_5] : memref<64x4xf32, #tpu.memory_space<vmem>>, vector<64x4xf32>
    %cst_6 = arith.constant dense<0.000000e+00> : vector<1x4xf32>
    %6 = tpu.matmul %4, %5, %cst_6 {dimension_numbers = #tpu.dot_dimension_numbers<[1], [0], [0], [1], [0, 0, 1, 1], [], []>} : vector<1x64xf32>, vector<64x4xf32>, vector<1x4xf32> -> vector<1x4xf32>
    %cst_7 = arith.constant 0.000000e+00 : f32
    %7 = vector.broadcast %cst_7 : f32 to vector<1x4xf32>
    %8 = arith.maximumf %6, %7 : vector<1x4xf32>
    %c0_8 = arith.constant 0 : index
    %c0_9 = arith.constant 0 : index
    %9 = vector.load %arg4[%c0_8, %c0_9] : memref<4x64xf32, #tpu.memory_space<vmem>>, vector<4x64xf32>
    %cst_10 = arith.constant dense<0.000000e+00> : vector<1x64xf32>
    %10 = tpu.matmul %8, %9, %cst_10 {dimension_numbers = #tpu.dot_dimension_numbers<[1], [0], [0], [1], [0, 0, 1, 1], [], []>} : vector<1x4xf32>, vector<4x64xf32>, vector<1x64xf32> -> vector<1x64xf32>
    %11 = arith.negf %10 : vector<1x64xf32>
    %12 = math.exp %11 : vector<1x64xf32>
    %cst_11 = arith.constant 1.000000e+00 : f32
    %13 = vector.broadcast %cst_11 : f32 to vector<1x64xf32>
    %14 = arith.addf %13, %12 : vector<1x64xf32>
    %15 = arith.divf %13, %14 : vector<1x64xf32>
    %16 = vector.shape_cast %15 : vector<1x64xf32> to vector<1x64x1xf32>
    %17 = vector.broadcast %16 : vector<1x64x1xf32> to vector<1x64x196xf32>
    %18 = arith.mulf %0, %17 : vector<1x64x196xf32>
    %c0_12 = arith.constant 0 : index
    %c0_13 = arith.constant 0 : index
    %c0_14 = arith.constant 0 : index
    %19 = vector.load %arg5[%c0_12, %c0_13, %c0_14] : memref<1x64x196xf32, #tpu.memory_space<vmem>>, vector<1x64x196xf32>
    tpu.vector_store %arg5[%c0_12, %c0_13, %c0_14], %18 {strides = array<i32>} : memref<1x64x196xf32, #tpu.memory_space<vmem>>, vector<1x64x196xf32>,
    return
  }
  func.func @transform_0(%arg0: i32) -> (i32, i32, i32) {
    %c0_i32 = arith.constant 0 : i32
    %c0_i32_0 = arith.constant 0 : i32
    %c0_i32_1 = arith.constant 0 : i32
    return %arg0, %c0_i32, %c0_i32_0 : i32, i32, i32
  }
  func.func @transform_1(%arg0: i32) -> (i32, i32) {
    %c0_i32 = arith.constant 0 : i32
    %c0_i32_0 = arith.constant 0 : i32
    %c0_i32_1 = arith.constant 0 : i32
    return %c0_i32, %c0_i32_0 : i32, i32
  }
  func.func @transform_2(%arg0: i32) -> (i32, i32) {
    %c0_i32 = arith.constant 0 : i32
    %c0_i32_0 = arith.constant 0 : i32
    %c0_i32_1 = arith.constant 0 : i32
    return %c0_i32, %c0_i32_0 : i32, i32
  }
  func.func @transform_3(%arg0: i32) -> (i32, i32) {
    %c0_i32 = arith.constant 0 : i32
    %c0_i32_0 = arith.constant 0 : i32
    %c0_i32_1 = arith.constant 0 : i32
    return %c0_i32, %c0_i32_0 : i32, i32
  }
  func.func @transform_4(%arg0: i32) -> (i32, i32, i32) {
    %c0_i32 = arith.constant 0 : i32
    %c0_i32_0 = arith.constant 0 : i32
    %c0_i32_1 = arith.constant 0 : i32
    return %arg0, %c0_i32, %c0_i32_0 : i32, i32, i32
  }
}

</mosaic_0001>

<bundles_post_ra>
// kernel: tpu_custom_call.1
= control target key start
LH: loop header
LB: loop body
LE: loop exit
PB: predicated region body
PF: predicated region fallthrough
CT: control target
= control target key end

     0   :  { %9 = vsyncpa [#allocation3], 0  ;;  %s1374_s0 = inlined_call_operand.hbm [shape: f32[2,64,196], index: 0, kind: input, shape index: {}]   ;;  %s1375_s1 = inlined_call_operand.hbm [shape: f32[64,196], index: 1, kind: input, shape index: {}]   ;;  %s1376_s2 = inlined_call_operand.vmem [shape: f32[64,4], index: 2, kind: input, shape index: {}]   ;;  %s1377_s3 = inlined_call_operand.vmem [shape: f32[4,64], index: 3, kind: input, shape index: {}]   ;;  %s1378_s4 = inlined_call_operand.hbm [shape: f32[2,64,196], index: 4, kind: output, shape index: {}]  }
   0x1   :  { %11 = vsyncpa [#allocation3 + $0x1], 0 }
   0x2   :  { %12 = vsyncpa [#allocation6], 0 }
   0x3   :  { %13 = vsyncpa [#allocation4], 0 }
   0x4   :  { %15 = vsyncpa [#allocation4 + $0x1], 0  ;;  %s1008_s15 = smov 0   ;;  %s1010_s16 = smov 0  }
   0x5   :  { %s1012_s17 = smov 0   ;;  %s1014_s18 = smov 0  }
   0x6 LB: > { %s1029_s19 = sadd.s32 4294967295, %s971_s18   ;;  %s706_s20 = sadd.s32 4294967294, %s971_s18   ;;  %s971_s18 = sphi %s1014_s18, %s1398_s18   ;;  %s967_s17 = sphi %s1012_s17, %s1397_s17   ;;  %s963_s16 = sphi %s1010_s16, %s1396_s16   ;;  %s959_s15 = sphi %s1008_s15, %s1395_s15  }
   0x7   : > { %p41_p0 = scmp.ne.s32.totalorder %s963_s16, %s959_s15  ;;  %p1379_p1 = scmp.eq.s32.totalorder %s1029_s19, 0 }
   0x8   : > { %p134_p3 = scmp.eq.s32.totalorder %s706_s20, 1  ;;  %p707_p5 = scmp.ge.s32.totalorder %s971_s18, 1 }
   0x9   : > { %p1038_p4 = por %p1379_p1, %p41_p0  ;;  %p141_p7 = scmp.lt.s32.totalorder %s971_s18, 3 }
   0xa   : > { %p1043_p6 = por %p134_p3, %p41_p0  ;;  %s973_s24 = smov [#allocation5]  }
   0xb   : > { %s1382_s21 = scalar_select %p1038_p4, 1, 0 }
   0xc   : > { %s1383_s22 = scalar_select %p1043_p6, 1, 0 }
   0xd   : > { %p1048_p8 = pnand %p707_p5, %p141_p7  ;;  %s153_s25 = sshll.u32 %s973_s24, 4  ;;  %s1052_s25 = int_to_ptr.vmem [resolvable:$true] %s153_s25 }
   0xe   : > { %s1064_s27 = sadd.s32 1, %s971_s18   ;;  %s28_s28 = sadd.s32 1, %s967_s17 }
   0xf   : > { %s1384_s23 = scalar_select %p1048_p8, 1, 0 }
  0x10   : > { %p783_p9 = pneg %p1048_p8  ;;  %s25_s29 = ssub.s32 %s971_s18, %s1064_s27 }
  0x11   : > { %s843_s6 = scalar_lea.hbm %s1375_s1, 2048 }
  0x12   : > { %p1059_p11 = pnand %p783_p9, %p1379_p1  ;;  %p844_p12 = scmp.ne.s32.totalorder %s1375_s1, %s843_s6 }
  0x13   : > { %p850_p5 = scmp.lt.u32.totalorder %s843_s6, %s1375_s1 }
  0x14   : > { %p845_p13 = pneg %p1059_p11 }
  0x16   : > { %p846_p0 = pnand %p845_p13, %p844_p12 }
  0x18   : > { %p847_p3 = pneg %p846_p0 }
  0x1a   : > { %p852_p7 = pnand %p850_p5, %p847_p3 }
  0x1c   : > { %855 = shalt.err (!%p852_p7)
}
  0x1d   : > { %s856_s11 = scalar_lea.vmem %s1052_s25, 2048  ;;  %p864_p2 = scmp.lt.s32.totalorder %s1052_s25, %s1052_s25 }
  0x1e   : > { %p857_p9 = scmp.ne.s32.totalorder %s1052_s25, %s856_s11  ;;  %p865_p6 = scmp.lt.s32.totalorder %s856_s11, %s856_s11 }
  0x20   : > { %p859_p10 = pnand %p857_p9, %p845_p13  ;;  %p866_p4 = por %p865_p6, %p864_p2 }
  0x22   : > { %p860_p1 = pneg %p859_p10 }
  0x24   : > { %p867_p8 = pnand %p866_p4, %p860_p1 }
  0x26   : > { %870 = shalt.err (!%p867_p8)
}
  0x27   : > { %s974_s12 = smov 256   ;;  %s975_s13 = smov 16  }
  0x28   : > { %786 = dma.hbm_to_vmem [thread:$0]  (!%p1059_p11), %s1375_s1, 2048, %s1052_s25, [#allocation6], %s974_s12, %s974_s12, %s975_s13  }
  0x29   : > { %p26_p1 = scmp.eq.s32.totalorder %s25_s29, 0  ;;  %p35_p2 = scmp.ne.s32.totalorder %s967_s17, %s963_s16 }
  0x2a   : > { %p36_p4 = scmp.eq.s32.totalorder %s971_s18, 0  ;;  %p796_p6 = scmp.lt.s32.totalorder %s971_s18, 2 }
  0x2b   : > { %s1098_s24 = scalar_select %p26_p1, %s967_s17, %s28_s28  }
  0x2c   : > { %p37_p8 = por %p36_p4, %p35_p2  ;;  %p1386_p10 = scmp.eq.s32.totalorder %s1029_s19, 1 }
  0x2d   : > { %s173_s26 = sand.u32 1, %s967_s17   ;;  %s726_s5 = sshll.u32 %s971_s18, 11 }
  0x2e   : > { %p1102_p12 = por %p1386_p10, %p35_p2  ;;  %s710_s6 = sshll.u32 %s173_s26, 7 }
  0x2f   : > { %s1111_s9 = scalar_lea.hbm %s1374_s0, %s726_s5  ;;  %s177_s25 = scalar_lea.vmem [#allocation2], %s710_s6 }
  0x30   : > { %s184_s28 = sshll.u32 %s177_s25, 4  ;;  %p1113_p11 = pnand %p796_p6, %p37_p8  ;;  %s1117_s28 = int_to_ptr.vmem [resolvable:$true] %s184_s28 }
  0x31   : > { %s1119_s10 = scalar_lea.sflag [#allocation3], %s173_s26  ;;  %s871_s11 = scalar_lea.hbm %s1111_s9, 2048 }
  0x32   : > { %p872_p13 = scmp.ne.s32.totalorder %s1111_s9, %s871_s11  ;;  %p873_p0 = pneg %p1113_p11 }
  0x33   : > { %s876_s5 = scalar_lea.hbm %s1374_s0, 4096  ;;  %p877_p7 = scmp.lt.u32.totalorder %s1111_s9, %s1374_s0 }
  0x34   : > { %p874_p3 = pnand %p873_p0, %p872_p13  ;;  %p878_p9 = scmp.lt.u32.totalorder %s876_s5, %s871_s11 }
  0x35   : > { %p880_p2 = scmp.lt.u32.totalorder %s871_s11, %s1111_s9 }
  0x36   : > { %p875_p5 = pneg %p874_p3  ;;  %p879_p1 = por %p878_p9, %p877_p7 }
  0x38   : > { %p881_p4 = por %p880_p2, %p879_p1 }
  0x3a   : > { %p882_p6 = pnand %p881_p4, %p875_p5 }
  0x3c   : > { %885 = shalt.err (!%p882_p6)
}
  0x3d   : > { %s886_s26 = scalar_lea.vmem %s1117_s28, 2048  ;;  %s976_s8 = smov [#allocation2]  }
  0x3e   : > { %p887_p8 = scmp.ne.s32.totalorder %s1117_s28, %s886_s26  ;;  %s891_s25 = sshll.u32 %s976_s8, 4  ;;  %s892_s25 = int_to_ptr.vmem [resolvable:$false] %s891_s25 }
  0x3f   : > { %s893_s14 = scalar_lea.vmem %s892_s25, 4096  ;;  %p894_p3 = scmp.lt.s32.totalorder %s1117_s28, %s892_s25 }
  0x40   : > { %p889_p10 = pnand %p887_p8, %p873_p0  ;;  %p895_p7 = scmp.lt.s32.totalorder %s893_s14, %s886_s26 }
  0x42   : > { %p890_p13 = pneg %p889_p10  ;;  %p896_p9 = por %p895_p7, %p894_p3 }
  0x44   : > { %p897_p1 = pnand %p896_p9, %p890_p13 }
  0x46   : > { %900 = shalt.err (!%p897_p1)
}
  0x47   : > { %790 = dma.hbm_to_vmem [thread:$0]  (!%p1113_p11), %s1111_s9, 2048, %s1117_s28, %s1119_s10, %s974_s12, %s974_s12, %s975_s13  }
  0x48   : > { %p1389_p0 = scmp.ne.s32.totalorder %s1384_s23, 0 }
  0x49   : > { %s1153_s11 = sand.u32 (!%p1389_p0), 1, %s963_s16   ;;  %p1390_p5 = scmp.ne.s32.totalorder (!%p1389_p0), %s1382_s21, 0 }
  0x4a   : > { %196 = sbr.rel (%p1389_p0) target bundleno = 853 (0x355), region = 36  ;;  %s714_s20 = sshll.u32 (!%p1389_p0), %s1153_s11, 7 }
  0x4b   : > { %s199_s5 = scalar_lea.sflag (!%p1389_p0), [#allocation3], %s1153_s11  ;;  %s1159_s29 = scalar_lea.vmem (!%p1389_p0), [#allocation2], %s714_s20 }
  0x51   : > { %946 = dma.done.wait (%p1390_p5), %s199_s5, 2048  }
  0x52   : > { %948 = vsyncadd (%p1390_p5), %s199_s5, 4294965248  ;;  %p1391_p11 = scmp.eq.s32.totalorder %s1029_s19, 0 }
  0x54   : > { %950 = dma.done.wait (%p1391_p11), [#allocation6], 2048   ;;  %p1392_p2 = pmov %p1391_p11 }
  0x55   : > { %v1170_v0 = vld [vmem:[%s1159_s29] sm:$0xff]  ;;  %v1173_v1 = vld [vmem:[%s1159_s29 + $0x8] sm:$0xff]  ;;  %vm279_vm0 = vcmask 556032   ;;  %v1184_v10 = vld [vmem:[%s1159_s29 + $0x10] sm:$0xff]  ;;  %vm978_vm1 = vmmov 0   ;;  %vm339_vm2 = vcmask 130112  }
  0x56   : > { %952 = vsyncadd (%p1392_p2), [#allocation6], 4294965248  ;;  %v247_v2 = vld [vmem:[#allocation5] sm:$0xff]  ;;  %v248_v3 = vld [vmem:[#allocation5 + $0x8] sm:$0xff]  ;;  %vm346_vm3 = vcmask 195712   ;;  %vm353_vm4 = vcmask 261312  }
  0x57   : > { %v263_v4 = vmul.f32 %v247_v2, %v1170_v0  ;;  %v1177_v5 = vld [vmem:[%s1159_s29 + $0x20] sm:$0xff]  ;;  %v1180_v6 = vld [vmem:[%s1159_s29 + $0x28] sm:$0xff]  ;;  %v264_v7 = vmul.f32 %v248_v3, %v1173_v1  ;;  %v1189_v13 = vld [vmem:[%s1159_s29 + $0x18] sm:$0xff]  ;;  %vm360_vm5 = vcmask 326912   ;;  %vm367_vm6 = vcmask 392512   ;;  %s1285_s13 = scalar_lea.vmem [#allocation7], %s714_s20 }
  0x58   : > { %v251_v8 = vld [vmem:[#allocation5 + $0x20] sm:$0xff]  ;;  %v252_v9 = vld [vmem:[#allocation5 + $0x28] sm:$0xff]  ;;  %v249_v14 = vld [vmem:[#allocation5 + $0x10] sm:$0xff]  ;;  %vm374_vm7 = vcmask 458112   ;;  %vm381_vm8 = vcmask 523712   ;;  %vm383_vm9 = vcmask 523264  }
  0x59   : > { %v267_v11 = vmul.f32 %v251_v8, %v1177_v5  ;;  %v268_v12 = vmul.f32 %v252_v9, %v1180_v6  ;;  %v250_v15 = vld [vmem:[#allocation5 + $0x18] sm:$0xff]  ;;  %v280_v16 = vsel %vm279_vm0, %v264_v7, 0.0  ;;  %v265_v17 = vmul.f32 %v249_v14, %v1184_v10  ;;  %v1195_v19 = vld [vmem:[%s1159_s29 + $0x30] sm:$0xff]  ;;  %v1203_v26 = vld [vmem:[%s1159_s29 + $0x40] sm:$0xff]  ;;  %s727_s20 = sshll.u32 %s1029_s19, 11  ;;  %s623_s9 = sshll.u32 %s1285_s13, 4  ;;  %s1325_s9 = int_to_ptr.vmem [resolvable:$true] %s623_s9 }
  0x5a   : > { %v266_v18 = vmul.f32 %v250_v15, %v1189_v13  ;;  %v1198_v20 = vld [vmem:[%s1159_s29 + $0x38] sm:$0xff]  ;;  %v253_v21 = vld [vmem:[#allocation5 + $0x30] sm:$0xff]  ;;  %v281_v22 = vadd.f32 %v280_v16, %v263_v4  ;;  %v1206_v27 = vld [vmem:[%s1159_s29 + $0x48] sm:$0xff]  ;;  %v977_v7 = vmov 0.0|0.0   ;;  %vm462_vm10 = vcmask 1043456   ;;  %s1323_s6 = scalar_lea.hbm %s1378_s4, %s727_s20  ;;  %s610_s19 = scalar_lea.sflag [#allocation4], %s1153_s11 }
  0x5b   : > { %v288_v23 = vsel %vm279_vm0, %v268_v12, 0.0  ;;  %v254_v24 = vld [vmem:[#allocation5 + $0x38] sm:$0xff]  ;;  %v269_v25 = vmul.f32 %v253_v21, %v1195_v19  ;;  %v255_v31 = vld [vmem:[#allocation5 + $0x40] sm:$0xff]  ;;  %v256_v32 = vld [vmem:[#allocation5 + $0x48] sm:$0xff]  ;;  %763 = vmatprep.subr.bf16.mxu0 %v977_v7  ;;  %v979_v21 = vmov 0.0   ;;  %vm458_vm11 = vcmask 31744  }
  0x5c   : > { %v289_v28 = vadd.f32 %v288_v23, %v267_v11  ;;  %v284_v29 = vsel %vm279_vm0, %v266_v18, 0.0  ;;  %v270_v30 = vmul.f32 %v254_v24, %v1198_v20  ;;  %v1211_v33 = vld [vmem:[%s1159_s29 + $0x50] sm:$0xff]  ;;  %282 = vadd.xlane.f32.xlu0 %v281_v22  ;;  %v271_v35 = vmul.f32 %v255_v31, %v1203_v26  ;;  %v1216_v37 = vld [vmem:[%s1159_s29 + $0x58] sm:$0xff]  ;;  %v1222_v43 = vld [vmem:[%s1159_s29 + $0x60] sm:$0xff]  ;;  %755 = vmatprep.mubr.msk.f32.mxu0 %vm978_vm1, %v979_v21  ;;  %s901_s7 = scalar_lea.vmem %s1325_s9, 2048  ;;  %s980_s26 = smov [#allocation7]  }
  0x5d   : > { %v285_v34 = vadd.f32 %v284_v29, %v265_v17  ;;  %v272_v36 = vmul.f32 %v256_v32, %v1206_v27  ;;  %v257_v38 = vld [vmem:[#allocation5 + $0x50] sm:$0xff]  ;;  %v258_v39 = vld [vmem:[#allocation5 + $0x58] sm:$0xff]  ;;  %v1225_v44 = vld [vmem:[%s1159_s29 + $0x68] sm:$0xff]  ;;  %758 = vmatprep.subr.mxu1 %v979_v21  ;;  %760 = vmatprep.mubr.msk.f32.mxu1 %vm978_vm1, %v979_v21  ;;  %v328_v22 = vlaneseq  ;;  %p902_p4 = scmp.ne.s32.totalorder %s1325_s9, %s901_s7  ;;  %s905_s8 = sshll.u32 %s980_s26, 4  ;;  %s906_s8 = int_to_ptr.vmem [resolvable:$false] %s905_s8 }
  0x5e   : > { %290 = vadd.xlane.f32.xlu1 %v289_v28  ;;  %v292_v40 = vsel %vm279_vm0, %v270_v30, 0.0  ;;  %v273_v41 = vmul.f32 %v257_v38, %v1211_v33  ;;  %v274_v42 = vmul.f32 %v258_v39, %v1216_v37  ;;  %v259_v45 = vld [vmem:[#allocation5 + $0x60] sm:$0xff]  ;;  %v260_v48 = vld [vmem:[#allocation5 + $0x68] sm:$0xff]  ;;  %v1229_v49 = vld [vmem:[%s1159_s29 + $0x70] sm:$0xff]  ;;  %s907_s25 = scalar_lea.vmem %s906_s8, 4096  ;;  %p908_p10 = scmp.lt.s32.totalorder %s1325_s9, %s906_s8 }
  0x5f   : > { %v293_v46 = vadd.f32 %v292_v40, %v269_v25  ;;  %v296_v47 = vsel %vm279_vm0, %v272_v36, 0.0  ;;  %v1232_v50 = vld [vmem:[%s1159_s29 + $0x78] sm:$0xff]  ;;  %v276_v52 = vmul.f32 %v260_v48, %v1225_v44  ;;  %v261_v53 = vld [vmem:[#allocation5 + $0x70] sm:$0xff]  ;;  %v275_v56 = vmul.f32 %v259_v45, %v1222_v43  ;;  %v312_v2 = vld [vmem:[%s1376_s2] sm:$0xff]  ;;  %p903_p6 = pnand %p902_p4, %p1102_p12  ;;  %p909_p13 = scmp.lt.s32.totalorder %s907_s25, %s901_s7 }
  0x60   : > { %v300_v51 = vsel %vm279_vm0, %v274_v42, 0.0  ;;  %v262_v54 = vld [vmem:[#allocation5 + $0x78] sm:$0xff]  ;;  %286 = vadd.xlane.f32.xlu0 %v285_v34  ;;  %v297_v55 = vadd.f32 %v296_v47, %v271_v35  ;;  %v277_v60 = vmul.f32 %v261_v53, %v1229_v49  ;;  %v313_v3 = vld [vmem:[%s1376_s2 + $0x8] sm:$0xff]  ;;  %v314_v8 = vld [vmem:[%s1376_s2 + $0x10] sm:$0xff]  ;;  %v329_v23 = vand.u32 127, %v328_v22 }
  0x61   : > { %v278_v57 = vmul.f32 %v262_v54, %v1232_v50  ;;  %v301_v58 = vadd.f32 %v300_v51, %v273_v41  ;;  %v304_v59 = vsel %vm279_vm0, %v276_v52, 0.0  ;;  %v764_v4 = vpack.c.bf16 %v313_v3, %v312_v2  ;;  %v315_v9 = vld [vmem:[%s1376_s2 + $0x18] sm:$0xff]  ;;  %v316_v12 = vld [vmem:[%s1376_s2 + $0x20] sm:$0xff]  ;;  %v317_v14 = vld [vmem:[%s1376_s2 + $0x28] sm:$0xff]  ;;  %p904_p8 = pneg %p903_p6  ;;  %p910_p3 = por %p909_p13, %p908_p10 }
  0x62   : > { %294 = vadd.xlane.f32.xlu1 %v293_v46  ;;  %v305_v62 = vadd.f32 %v304_v59, %v275_v56  ;;  %v767_v11 = vpack.c.bf16 %v315_v9, %v314_v8  ;;  %v770_v15 = vpack.c.bf16 %v317_v14, %v316_v12  ;;  %v318_v16 = vld [vmem:[%s1376_s2 + $0x30] sm:$0xff]  ;;  %v319_v17 = vld [vmem:[%s1376_s2 + $0x38] sm:$0xff]  ;;  %v1265_v24 = vshrl.u32 %v328_v22, 7  ;;  %v457_v12 = vld [vmem:[%s1377_s3] sm:$0xf] }
  0x63   : > { %v308_v61 = vsel %vm279_vm0, %v278_v57, 0.0  ;;  %765 = vmatpush3.bf16.msra.mxu0 %v764_v4  ;;  %v773_v18 = vpack.c.bf16 %v319_v17, %v318_v16  ;;  %v334_v25 = vadd.s32 4294967288, %v329_v23  ;;  %v341_v28 = vadd.s32 4294967280, %v329_v23  ;;  %759 = vmatpush3.msk.msra.mxu1 %vm462_vm10, %v457_v12  ;;  %p911_p7 = pnand %p910_p3, %p904_p8 }
  0x64   : > { %298 = vadd.xlane.f32.xlu0 %v297_v55  ;;  %v309_v63 = vadd.f32 %v308_v61, %v277_v60  ;;  %766 = vmatprep.subr.bf16.mxu0 %v977_v7  ;;  %v348_v29 = vadd.s32 4294967272, %v329_v23  ;;  %v332_v31 = vsub.s32 %v329_v23, %v1265_v24  ;;  %v355_v35 = vadd.s32 4294967264, %v329_v23 }
  0x65   : > { %v337_v34 = vsub.s32 %v334_v25, %v1265_v24  ;;  %v344_v36 = vsub.s32 %v341_v28, %v1265_v24  ;;  %v362_v39 = vadd.s32 4294967256, %v329_v23  ;;  %v369_v47 = vadd.s32 4294967248, %v329_v23 }
  0x66   : > { %302 = vadd.xlane.f32.xlu1 %v301_v58  ;;  %v351_v38 = vsub.s32 %v348_v29, %v1265_v24  ;;  %v358_v46 = vsub.s32 %v355_v35, %v1265_v24  ;;  %v376_v53 = vadd.s32 4294967240, %v329_v23  ;;  %v544_v25 = vsub.s32 0, %v1265_v24 }
  0x67   : > { %768 = vmatpush3.bf16.msra.mxu0 %v767_v11  ;;  %v365_v52 = vsub.s32 %v362_v39, %v1265_v24  ;;  %v372_v60 = vsub.s32 %v369_v47, %v1265_v24 }
  0x68   : > { %306 = vadd.xlane.f32.xlu0 %v305_v62  ;;  %769 = vmatprep.subr.bf16.mxu0 %v977_v7  ;;  %v379_v62 = vsub.s32 %v376_v53, %v1265_v24 }
  0x6a   : > { %310 = vadd.xlane.f32.xlu1 %v309_v63 }
  0x6b   : > { %771 = vmatpush3.bf16.msra.mxu0 %v770_v15 }
  0x6c   : > { %772 = vmatprep.subr.bf16.mxu0 %v977_v7 }
  0x6f   : > { %774 = vmatpush3.bf16.msra.mxu0 %v773_v18 }
  0xe9   : > { %v283_v30 = vpop.xlane.xlu0 %282 }
  0xea   : > { %v333_v41 = vrot.slane %v283_v30, %v332_v31 }
  0xeb   : > { %v291_v32 = vpop.xlane.xlu1 %290 }
  0xec   : > { %v345_v48 = vrot.slane %v291_v32, %v344_v36 }
  0xed   : > { %v287_v40 = vpop.xlane.xlu0 %286 }
  0xee   : > { %v338_v42 = vrot.slane %v287_v40, %v337_v34 }
  0xef   : > { %v295_v45 = vpop.xlane.xlu1 %294 }
  0xf0   : > { %v352_v51 = vrot.slane %v295_v45, %v351_v38  ;;  %v340_v54 = vsel %vm339_vm2, %v338_v42, %v333_v41 }
  0xf1   : > { %v347_v55 = vsel %vm346_vm3, %v345_v48, %v340_v54  ;;  %v299_v56 = vpop.xlane.xlu0 %298 }
  0xf2   : > { %v354_v57 = vsel %vm353_vm4, %v352_v51, %v347_v55  ;;  %v359_v58 = vrot.slane %v299_v56, %v358_v46 }
  0xf3   : > { %v303_v59 = vpop.xlane.xlu1 %302 }
  0xf4   : > { %v366_v61 = vrot.slane %v303_v59, %v365_v52  ;;  %v361_v63 = vsel %vm360_vm5, %v359_v58, %v354_v57 }
  0xf5   : > { %v307_v2 = vpop.xlane.xlu0 %306 }
  0xf6   : > { %v373_v3 = vrot.slane %v307_v2, %v372_v60  ;;  %v368_v7 = vsel %vm367_vm6, %v366_v61, %v361_v63 }
  0xf7   : > { %v311_v4 = vpop.xlane.xlu1 %310 }
  0xf8   : > { %v380_v8 = vrot.slane %v311_v4, %v379_v62  ;;  %v375_v9 = vsel %vm374_vm7, %v373_v3, %v368_v7 }
  0xfa   : > { %v382_v11 = vsel %vm381_vm8, %v380_v8, %v375_v9 }
  0xfb   : > { %756 = vmatmul.mubr.msk.f32.vlgmr.msra.gmra.mrb[0].mxu0 %vm383_vm9, %v382_v11 }
 0x1ce   : > { %v452_v14 = vpop.f32.mrb[0].mxu0 }
 0x1cf   : > { %v456_v15 = vmax.f32 %v452_v14, 0.0  ;;  %v757_v16 = vpop.f32.mrb[1].mxu0 }
 0x1d1   : > { %761 = vmatmul.mubr.msk.f32.vlgmr.msra.gmra.mrb[0].mxu1 %vm458_vm11, %v456_v15 }
 0x2a4   : > { %v532_v17 = vpop.f32.mrb[0].mxu1 }
 0x2a5   : > { %v720_v18 = vmul.f32 -1.442695, %v532_v17  ;;  %v762_v21 = vpop.f32.mrb[1].mxu1 }
 0x2a7   : > { %839 = vpow2.f32 %v720_v18 }
 0x2b1   : > { %v840_v22 = vpop.eup %839 }
 0x2b2   : > { %v539_v23 = vadd.f32 1.0, %v840_v22 }
 0x2b4   : > { %841 = vrcp.f32 %v539_v23 }
 0x2be   : > { %v842_v28 = vpop.eup %841 }
 0x2bf   : > { %v545_v29 = vrot.slane %v842_v28, %v544_v25 }
 0x2c1   : > { %551 = vbcast.lane.b32.xlu1 %v545_v29, 264  ;;  %547 = vbcast.lane.b32.xlu0 %v545_v29, 256 }
 0x2c5   : > { %555 = vbcast.lane.b32.xlu1 %v545_v29, 272  ;;  %563 = vbcast.lane.b32.xlu0 %v545_v29, 288 }
 0x2c9   : > { %559 = vbcast.lane.b32.xlu1 %v545_v29, 280  ;;  %571 = vbcast.lane.b32.xlu0 %v545_v29, 304 }
 0x2cd   : > { %567 = vbcast.lane.b32.xlu1 %v545_v29, 296 }
 0x2d1   : > { %575 = vbcast.lane.b32.xlu1 %v545_v29, 312 }
 0x333   : > { %v552_v30 = vpop.permute.xlu1 %551  ;;  %v548_v31 = vpop.permute.xlu0 %547 }
 0x334   : > { %v579_v32 = vmul.f32 %v552_v30, %v1184_v10  ;;  %v580_v34 = vmul.f32 %v552_v30, %v1189_v13  ;;  %v577_v35 = vmul.f32 %v548_v31, %v1170_v0  ;;  %v578_v24 = vmul.f32 %v548_v31, %v1173_v1 }
 0x336   : > { %595 = vst [vmem:[%s1285_s13 + $0x10] sm:$0xff] %v579_v32  ;;  %596 = vst.msk [vmem:[%s1285_s13 + $0x18] sm:$0xff] %vm279_vm0, %v580_v34 }
 0x337   : > { %593 = vst [vmem:[%s1285_s13] sm:$0xff] %v577_v35  ;;  %594 = vst.msk [vmem:[%s1285_s13 + $0x8] sm:$0xff] %vm279_vm0, %v578_v24  ;;  %v556_v0 = vpop.permute.xlu1 %555  ;;  %v564_v1 = vpop.permute.xlu0 %563 }
 0x338   : > { %v581_v10 = vmul.f32 %v556_v0, %v1177_v5  ;;  %v582_v13 = vmul.f32 %v556_v0, %v1180_v6  ;;  %v585_v36 = vmul.f32 %v564_v1, %v1203_v26  ;;  %v586_v38 = vmul.f32 %v564_v1, %v1206_v27 }
 0x33a   : > { %597 = vst [vmem:[%s1285_s13 + $0x20] sm:$0xff] %v581_v10  ;;  %598 = vst.msk [vmem:[%s1285_s13 + $0x28] sm:$0xff] %vm279_vm0, %v582_v13 }
 0x33b   : > { %601 = vst [vmem:[%s1285_s13 + $0x40] sm:$0xff] %v585_v36  ;;  %602 = vst.msk [vmem:[%s1285_s13 + $0x48] sm:$0xff] %vm279_vm0, %v586_v38  ;;  %v560_v39 = vpop.permute.xlu1 %559  ;;  %v572_v5 = vpop.permute.xlu0 %571 }
 0x33c   : > { %v583_v40 = vmul.f32 %v560_v39, %v1195_v19  ;;  %v584_v6 = vmul.f32 %v560_v39, %v1198_v20  ;;  %v589_v26 = vmul.f32 %v572_v5, %v1222_v43  ;;  %v590_v27 = vmul.f32 %v572_v5, %v1225_v44 }
 0x33e   : > { %599 = vst [vmem:[%s1285_s13 + $0x30] sm:$0xff] %v583_v40  ;;  %600 = vst.msk [vmem:[%s1285_s13 + $0x38] sm:$0xff] %vm279_vm0, %v584_v6 }
 0x33f   : > { %605 = vst [vmem:[%s1285_s13 + $0x60] sm:$0xff] %v589_v26  ;;  %606 = vst.msk [vmem:[%s1285_s13 + $0x68] sm:$0xff] %vm279_vm0, %v590_v27  ;;  %v568_v41 = vpop.permute.xlu1 %567 }
 0x340   : > { %v587_v42 = vmul.f32 %v568_v41, %v1211_v33  ;;  %v588_v19 = vmul.f32 %v568_v41, %v1216_v37 }
 0x342   : > { %603 = vst [vmem:[%s1285_s13 + $0x50] sm:$0xff] %v587_v42  ;;  %604 = vst.msk [vmem:[%s1285_s13 + $0x58] sm:$0xff] %vm279_vm0, %v588_v19 }
 0x343   : > { %v576_v20 = vpop.permute.xlu1 %575 }
 0x344   : > { %v591_v33 = vmul.f32 %v576_v20, %v1229_v49  ;;  %v592_v37 = vmul.f32 %v576_v20, %v1232_v50 }
 0x346   : > { %607 = vst [vmem:[%s1285_s13 + $0x70] sm:$0xff] %v591_v33  ;;  %608 = vst.msk [vmem:[%s1285_s13 + $0x78] sm:$0xff] %vm279_vm0, %v592_v37 }
 0x347   : > { %914 = shalt.err (!%p911_p7)
}
 0x348   : > { %s915_s14 = scalar_lea.hbm %s1323_s6, 2048  ;;  %s919_s21 = scalar_lea.hbm %s1378_s4, 4096 }
 0x349   : > { %p916_p9 = scmp.ne.s32.totalorder %s1323_s6, %s915_s14  ;;  %p920_p5 = scmp.lt.u32.totalorder %s1323_s6, %s1378_s4 }
 0x34a   : > { %p921_p11 = scmp.lt.u32.totalorder %s919_s21, %s915_s14  ;;  %p923_p4 = scmp.lt.u32.totalorder %s915_s14, %s1323_s6 }
 0x34b   : > { %p917_p1 = pnand %p916_p9, %p1102_p12 }
 0x34c   : > { %p922_p2 = por %p921_p11, %p920_p5 }
 0x34d   : > { %p918_p0 = pneg %p917_p1 }
 0x34e   : > { %p924_p6 = por %p923_p4, %p922_p2 }
 0x350   : > { %p925_p8 = pnand %p924_p6, %p918_p0 }
 0x352   : > { %928 = shalt.err (!%p925_p8)
}
 0x353   : > { %s981_s13 = smov 256   ;;  %s982_s20 = smov 16  }
 0x354   : > { %781 = dma.vmem_to_hbm [thread:$0]  (%p1102_p12), %s1325_s9, 2048, %s1323_s6, %s610_s19, %s981_s13, %s981_s13, %s982_s20  }
 0x355 PF: > { %s638_s28 = sand.u32 1, %s959_s15   ;;  %p1393_p10 = scmp.ne.s32.totalorder %s1383_s22, 0 }
 0x356   : > { %p1394_p13 = scmp.ge.s32.totalorder %s971_s18, 2  ;;  %s639_s10 = scalar_lea.sflag [#allocation4], %s638_s28 }
 0x358   : > { %p792_p3 = pnand %p1394_p13, %p1393_p10 }
 0x35a   : > { %954 = dma.done.wait (!%p792_p3), %s639_s10, 2048  }
 0x35b   : > { %956 = vsyncadd (!%p792_p3), %s639_s10, 4294965248  ;;  %p18_p7 = scmp.ge.s32.totalorder %s1064_s27, 4   ;;  %s1395_s15 = smov %s963_s16 }
 0x35c   : > { %s1396_s16 = smov %s967_s17  ;;  %s1397_s17 = smov %s1098_s24 }
 0x35d   : > { %s1398_s18 = smov %s1064_s27  ;;  %20 = sbr.rel (!%p18_p7) target bundleno = 6 (0x6), region = 85 }
 0x364   :  { %644 = vsyncpa [#allocation3], 1 }
 0x365   :  { %646 = vsyncpa [#allocation3 + $0x1], 1 }
 0x366   :  { %647 = vsyncpa [#allocation6], 1 }
 0x367   :  { %648 = vsyncpa [#allocation4], 1 }
 0x368   :  { %650 = vsyncpa [#allocation4 + $0x1], 1 }

</bundles_post_ra>
